<compile_context>
chip_gen: v5e
topology: v5e:2x2
jax: 0.10.0
libtpu: 0.0.40
codegen_flags: <defaults>
</compile_context>

<pallas_src>
import jax
import jax.numpy as jnp
from jax.experimental import pallas as pl
from jax.experimental.pallas import tpu as pltpu


def _cdiv(a, b):
    return -(-a // b)


def _round_up(a, b):
    return _cdiv(a, b) * b


def _vmem_limit_bytes():
    # Generation-aware scoped-VMEM limit: ~48 MiB on v5e/v6e (128 MiB VMEM
    # per core), ~32 MiB on v7x (64 MiB per core).
    try:
        cap = int(pltpu.get_tpu_info().vmem_capacity_bytes)
    except Exception:
        cap = 128 * 1024 * 1024
    return int(min(cap // 2, 48 * 1024 * 1024))


def _as_nchw(x):
    if x.ndim == 4:
        return x
    if x.ndim == 3:
        return x[None]
    if x.ndim == 2:
        return x[None, None]
    lead = 1
    for d in x.shape[:-3]:
        lead *= d
    return x.reshape((lead,) + x.shape[-3:])


def _pick_tiling(B, C, HW, itemsize):
    """Pick lane-chunk LB (multiple of 128), #chunks NC, partitions P, steps S."""
    c_pad = _round_up(C, 8)                       # sublane padding of a block
    bytes_per_col = B * c_pad * max(itemsize, 4)  # per input, per lane column
    target_block_bytes = 1 << 20                  # ~1 MiB per input block
    lb = max(128, (target_block_bytes // bytes_per_col) // 128 * 128)
    lb = min(lb, _round_up(HW, 128))
    nc = _cdiv(HW, lb)
    # Prefer enough chunks that the pipeline overlaps DMA with compute and
    # both v7x TensorCores get work; stop at the 128-lane minimum.
    while lb > 128 and nc < 8:
        lb = max(128, (lb // 2) // 128 * 128)
        nc = _cdiv(HW, lb)
    p = 2 if nc >= 2 else 1
    s = _cdiv(nc, p)
    return lb, nc, p, s


def _l2_sums(p4, g4, w4=None):
    """Return (sum((p-g)^2 * broadcast(w)), sum(w)).  w4 may be None."""
    B, C, H, W = p4.shape
    HW = H * W
    p3 = p4.reshape(B, C, HW)   # free reshape (contiguous NCHW)
    g3 = g4.reshape(B, C, HW)

    itemsize = max(p4.dtype.itemsize, g4.dtype.itemsize)
    LB, NC, P, S = _pick_tiling(B, C, HW, itemsize)
    apply_tail_mask = (P * S * LB != HW)

    # TODO(synk): if B * round_up(C, 8) * 128 * 4 alone exceeds the VMEM
    # budget (enormous B*C), the batch axis would also need chunking.

    def col_block(p, s):
        j = p * S + s
        if P * S > NC:                       # clamp the rare overflow step
            j = jnp.minimum(j, NC - 1)
        return j

    def tail_mask(j):
        col = j * LB + jax.lax.broadcasted_iota(jnp.int32, (1, 1, LB), 2)
        return col < HW

    in_spec = pl.BlockSpec((B, C, LB), lambda p, s: (0, 0, col_block(p, s)))
    out_sq_spec = pl.BlockSpec((None, B, C, LB), lambda p, s: (p, 0, 0, 0))

    cparams = pltpu.CompilerParams(
        dimension_semantics=("parallel", "arbitrary"),
        vmem_limit_bytes=_vmem_limit_bytes())

    out_sq_bytes = P * B * C * LB * 4

    if w4 is None:
        def kernel(p_ref, g_ref, acc_ref):
            @pl.when(pl.program_id(1) == 0)
            def _init():
                acc_ref[...] = jnp.zeros_like(acc_ref)
            d = p_ref[...].astype(jnp.float32) - g_ref[...].astype(jnp.float32)
            d2 = d * d
            if apply_tail_mask:
                j = pl.program_id(0) * S + pl.program_id(1)
                d2 = jnp.where(tail_mask(j), d2, 0.0)
            acc_ref[...] += d2

        cost = pl.CostEstimate(
            flops=3 * p4.size, transcendentals=0,
            bytes_accessed=p4.size * p4.dtype.itemsize
            + g4.size * g4.dtype.itemsize + out_sq_bytes)

        partial = pl.pallas_call(
            kernel,
            out_shape=jax.ShapeDtypeStruct((P, B, C, LB), jnp.float32),
            grid_spec=pltpu.PrefetchScalarGridSpec(
                num_scalar_prefetch=0,
                grid=(P, S),
                in_specs=[in_spec, in_spec],
                out_specs=out_sq_spec),
            compiler_params=cparams,
            cost_estimate=cost,
        )(p3, g3)
        return jnp.sum(partial), None

    Bv, Cv = int(w4.shape[0]), int(w4.shape[1])
    w3 = w4.reshape(Bv, Cv, HW)
    w_spec = pl.BlockSpec((Bv, Cv, LB), lambda p, s: (0, 0, col_block(p, s)))
    out_w_spec = pl.BlockSpec((None, Bv, Cv, LB), lambda p, s: (p, 0, 0, 0))

    def kernel(p_ref, g_ref, w_ref, accsq_ref, accw_ref):
        @pl.when(pl.program_id(1) == 0)
        def _init():
            accsq_ref[...] = jnp.zeros_like(accsq_ref)
            accw_ref[...] = jnp.zeros_like(accw_ref)
        p = p_ref[...].astype(jnp.float32)
        g = g_ref[...].astype(jnp.float32)
        w = w_ref[...].astype(jnp.float32)       # (Bv, Cv, LB), un-expanded
        d = p - g
        d2 = d * d
        if apply_tail_mask:
            j = pl.program_id(0) * S + pl.program_id(1)
            m = tail_mask(j)
            d2 = jnp.where(m, d2, 0.0)
            w = jnp.where(m, w, 0.0)
        wb = jnp.broadcast_to(w, d2.shape)       # expand over B / C in VMEM only
        accsq_ref[...] += d2 * wb
        accw_ref[...] += w                       # un-broadcast weight sum

    cost = pl.CostEstimate(
        flops=6 * p4.size, transcendentals=0,
        bytes_accessed=p4.size * p4.dtype.itemsize
        + g4.size * g4.dtype.itemsize + w4.size * w4.dtype.itemsize
        + out_sq_bytes + P * Bv * Cv * LB * 4)

    sq_p, w_p = pl.pallas_call(
        kernel,
        out_shape=(jax.ShapeDtypeStruct((P, B, C, LB), jnp.float32),
                   jax.ShapeDtypeStruct((P, Bv, Cv, LB), jnp.float32)),
        grid_spec=pltpu.PrefetchScalarGridSpec(
            num_scalar_prefetch=0,
            grid=(P, S),
            in_specs=[in_spec, in_spec, w_spec],
            out_specs=(out_sq_spec, out_w_spec)),
        compiler_params=cparams,
        cost_estimate=cost,
    )(p3, g3, w3)
    return jnp.sum(sq_p), jnp.sum(w_p)


def l2_loss(pred, gt, valid=None, boundary_ignore=None):
    """Pallas equivalent of L2Loss.forward (returns a scalar float32)."""
    if boundary_ignore:                 # 0 / None => no crop
        bi = boundary_ignore
        pred = pred[..., bi:-bi, bi:-bi]
        gt = gt[..., bi:-bi, bi:-bi]
        if valid is not None:
            valid = valid[..., bi:-bi, bi:-bi]

    p4 = _as_nchw(pred)
    g4 = _as_nchw(gt)

    if valid is None:
        # F.mse_loss default reduction='mean': sum((p-g)^2) / numel.
        sumsq, _ = _l2_sums(p4, g4, None)
        return sumsq / jnp.float32(p4.size)

    w = valid
    if not jnp.issubdtype(w.dtype, jnp.floating):
        w = w.astype(jnp.float32)

    B, C, H, W = p4.shape
    if pred.ndim <= 4 and w.ndim <= 4:
        # torch/numpy right-aligned broadcasting: prepend size-1 dims.
        while w.ndim < 4:
            w = w[None]
        Bv, Cv, Hv, Wv = w.shape
        if not (Bv in (1, B) and Cv in (1, C) and Hv == H and Wv == W):
            # Uncommon broadcast pattern: fall back to a full-size mask.
            w = jnp.broadcast_to(w, p4.shape)
    else:
        # TODO(synk): >4-D masks are materialized at full pred size.
        w = _as_nchw(jnp.broadcast_to(w, pred.shape))

    # PyTorch: denom = valid.sum() * (pred.numel / valid.numel) + eps.
    # sum(w_fed) * (pred.numel / w_fed.numel) is identical for any
    # broadcast-consistent w_fed, so elem_ratio uses the mask we stream.
    elem_ratio = p4.size / w.size
    sumsq, sumw = _l2_sums(p4, g4, w)
    return sumsq / (sumw * jnp.float32(elem_ratio) + jnp.float32(1e-12))


# --------------------------------------------------------------------------
# Self-test
# --------------------------------------------------------------------------
if __name__ == "__main__":
    key = jax.random.PRNGKey(0)
    k1, k2, k3 = jax.random.split(key, 3)

    B, C, H, W = 2, 4, 16, 16
    pred = jax.random.normal(k1, (B, C, H, W), jnp.float32)
    gt = jax.random.normal(k2, (B, C, H, W), jnp.float32)
    valid = (jax.random.uniform(k3, (B, 1, H, W)) > 0.3)   # broadcasts over C

    # 1) Unmasked (F.mse_loss, reduction='mean'); H*W divisible by 128.
    mse_plain = jax.block_until_ready(l2_loss(pred, gt))
    ref_plain = jnp.mean((pred - gt) ** 2)
    assert jnp.allclose(mse_plain, ref_plain, rtol=1e-5, atol=1e-6), (
        mse_plain, ref_plain)

    # 2) Unmasked with boundary_ignore=1 -> H*W = 196 exercises the
    #    lane-tail masking path.
    mse_crop = jax.block_until_ready(l2_loss(pred, gt, boundary_ignore=1))
    p_c1 = pred[..., 1:-1, 1:-1]
    g_c1 = gt[..., 1:-1, 1:-1]
    ref_crop = jnp.mean((p_c1 - g_c1) ** 2)
    assert jnp.allclose(mse_crop, ref_crop, rtol=1e-5, atol=1e-6), (
        mse_crop, ref_crop)

    # 3) Masked with valid + boundary_ignore=2 (matches the PyTorch module).
    mse_masked = jax.block_until_ready(
        l2_loss(pred, gt, valid=valid, boundary_ignore=2))
    p_c = pred[..., 2:-2, 2:-2]
    g_c = gt[..., 2:-2, 2:-2]
    v_c = valid[..., 2:-2, 2:-2].astype(jnp.float32)
    se = (p_c - g_c) ** 2
    elem_ratio = se.size / v_c.size
    ref_masked = (se * v_c).sum() / (v_c.sum() * elem_ratio + 1e-12)
    assert jnp.allclose(mse_masked, ref_masked, rtol=1e-5, atol=1e-6), (
        mse_masked, ref_masked)

    print("KERNEL_OK")
</pallas_src>

<mosaic_0001>
module attributes {stable_mosaic.version = 11 : i64} {
  func.func @kernel(%arg0: i32, %arg1: i32, %arg2: memref<2x4x128xf32, #tpu.memory_space<vmem>>, %arg3: memref<2x4x128xf32, #tpu.memory_space<vmem>>, %arg4: memref<1x2x4x128xf32, #tpu.memory_space<vmem>>) attributes {dimension_semantics = [#tpu.dimension_semantics<parallel>, #tpu.dimension_semantics<arbitrary>], iteration_bounds = array<i64: 2, 1>, scalar_prefetch = 0 : i64, scratch_operands = 0 : i64, tpu.core_type = #tpu.core_type<tc>, window_params = [{transform_indices = @transform_0, window_bounds = array<i64: 2, 4, 128>}, {transform_indices = @transform_1, window_bounds = array<i64: 2, 4, 128>}, {transform_indices = @transform_2, window_bounds = array<i64: 1, 2, 4, 128>}]} {
    %c0_i32 = arith.constant 0 : i32
    %0 = arith.cmpi eq, %arg1, %c0_i32 : i32
    %1 = arith.extui %0 : i1 to i32
    %c0_i32_0 = arith.constant 0 : i32
    %2 = arith.cmpi ne, %1, %c0_i32_0 : i32
    scf.if %2 {
      %cst = arith.constant 0.000000e+00 : f32
      %13 = vector.broadcast %cst : f32 to vector<2x4x128xf32>
      %c0_14 = arith.constant 0 : index
      %c0_15 = arith.constant 0 : index
      %c0_16 = arith.constant 0 : index
      %c0_17 = arith.constant 0 : index
      %14 = vector.load %arg4[%c0_14, %c0_15, %c0_16, %c0_17] : memref<1x2x4x128xf32, #tpu.memory_space<vmem>>, vector<1x2x4x128xf32>
      %15 = vector.shape_cast %14 : vector<1x2x4x128xf32> to vector<2x4x128xf32>
      %16 = vector.shape_cast %13 : vector<2x4x128xf32> to vector<1x2x4x128xf32>
      tpu.vector_store %arg4[%c0_14, %c0_15, %c0_16, %c0_17], %16 {strides = array<i32>} : memref<1x2x4x128xf32, #tpu.memory_space<vmem>>, vector<1x2x4x128xf32>,
    } else {
    }
    %c0 = arith.constant 0 : index
    %c0_1 = arith.constant 0 : index
    %c0_2 = arith.constant 0 : index
    %3 = vector.load %arg2[%c0, %c0_1, %c0_2] : memref<2x4x128xf32, #tpu.memory_space<vmem>>, vector<2x4x128xf32>
    %c0_3 = arith.constant 0 : index
    %c0_4 = arith.constant 0 : index
    %c0_5 = arith.constant 0 : index
    %4 = vector.load %arg3[%c0_3, %c0_4, %c0_5] : memref<2x4x128xf32, #tpu.memory_space<vmem>>, vector<2x4x128xf32>
    %5 = arith.subf %3, %4 : vector<2x4x128xf32>
    %6 = arith.mulf %5, %5 : vector<2x4x128xf32>
    %c0_6 = arith.constant 0 : index
    %c0_7 = arith.constant 0 : index
    %c0_8 = arith.constant 0 : index
    %c0_9 = arith.constant 0 : index
    %7 = vector.load %arg4[%c0_6, %c0_7, %c0_8, %c0_9] : memref<1x2x4x128xf32, #tpu.memory_space<vmem>>, vector<1x2x4x128xf32>
    %8 = vector.shape_cast %7 : vector<1x2x4x128xf32> to vector<2x4x128xf32>
    %9 = arith.addf %8, %6 : vector<2x4x128xf32>
    %c0_10 = arith.constant 0 : index
    %c0_11 = arith.constant 0 : index
    %c0_12 = arith.constant 0 : index
    %c0_13 = arith.constant 0 : index
    %10 = vector.load %arg4[%c0_10, %c0_11, %c0_12, %c0_13] : memref<1x2x4x128xf32, #tpu.memory_space<vmem>>, vector<1x2x4x128xf32>
    %11 = vector.shape_cast %10 : vector<1x2x4x128xf32> to vector<2x4x128xf32>
    %12 = vector.shape_cast %9 : vector<2x4x128xf32> to vector<1x2x4x128xf32>
    tpu.vector_store %arg4[%c0_10, %c0_11, %c0_12, %c0_13], %12 {strides = array<i32>} : memref<1x2x4x128xf32, #tpu.memory_space<vmem>>, vector<1x2x4x128xf32>,
    return
  }
  func.func @transform_0(%arg0: i32, %arg1: i32) -> (i32, i32, i32) {
    %c1_i32 = arith.constant 1 : i32
    %0 = arith.muli %arg0, %c1_i32 : i32
    %1 = arith.addi %0, %arg1 : i32
    %c0_i32 = arith.constant 0 : i32
    %c0_i32_0 = arith.constant 0 : i32
    %c0_i32_1 = arith.constant 0 : i32
    return %c0_i32, %c0_i32_0, %1 : i32, i32, i32
  }
  func.func @transform_1(%arg0: i32, %arg1: i32) -> (i32, i32, i32) {
    %c1_i32 = arith.constant 1 : i32
    %0 = arith.muli %arg0, %c1_i32 : i32
    %1 = arith.addi %0, %arg1 : i32
    %c0_i32 = arith.constant 0 : i32
    %c0_i32_0 = arith.constant 0 : i32
    %c0_i32_1 = arith.constant 0 : i32
    return %c0_i32, %c0_i32_0, %1 : i32, i32, i32
  }
  func.func @transform_2(%arg0: i32, %arg1: i32) -> (i32, i32, i32, i32) {
    %c0_i32 = arith.constant 0 : i32
    %c0_i32_0 = arith.constant 0 : i32
    %c0_i32_1 = arith.constant 0 : i32
    %c0_i32_2 = arith.constant 0 : i32
    return %arg0, %c0_i32, %c0_i32_0, %c0_i32_1 : i32, i32, i32, i32
  }
}

</mosaic_0001>

<bundles_post_ra>
// kernel: tpu_custom_call.1
= control target key start
LH: loop header
LB: loop body
LE: loop exit
PB: predicated region body
PF: predicated region fallthrough
CT: control target
= control target key end

     0   :  { %s767_s0 = inlined_call_operand.hbm [shape: f32[2,4,256], index: 0, kind: input, shape index: {}]   ;;  %s768_s1 = inlined_call_operand.hbm [shape: f32[2,4,256], index: 1, kind: input, shape index: {}]   ;;  %s769_s2 = inlined_call_operand.hbm [shape: f32[2,2,4,128], index: 2, kind: output, shape index: {}]  }
   0x1   :  { %770 = sst [smem:[#allocation11_spill]] %s767_s0 }
   0x2   :  { %7 = vsyncpa [#allocation3], 0 }
   0x3   :  { %9 = vsyncpa [#allocation3 + $0x1], 0 }
   0x4   :  { %10 = vsyncpa [#allocation6], 0 }
   0x5   :  { %12 = vsyncpa [#allocation6 + $0x1], 0 }
   0x6   :  { %13 = vsyncpa [#allocation4], 0 }
   0x7   :  { %15 = vsyncpa [#allocation4 + $0x1], 0  ;;  %s626_s9 = smov 0   ;;  %s628_s10 = smov 0  }
   0x8   :  { %s630_s11 = smov 0   ;;  %s632_s12 = smov 0  }
   0x9   :  { %s634_s13 = smov 0   ;;  %s636_s14 = smov 0  }
   0xa LB: > { %s366_s15 = sadd.s32 4294967295, %s603_s14   ;;  %s367_s16 = sadd.s32 4294967294, %s603_s14   ;;  %s603_s14 = sphi %s636_s14, %s21_s14   ;;  %s599_s13 = sphi %s634_s13, %s781_s13   ;;  %s595_s12 = sphi %s632_s12, %s780_s12   ;;  %s591_s11 = sphi %s630_s11, %s779_s11   ;;  %s587_s10 = sphi %s628_s10, %s778_s10   ;;  %s583_s9 = sphi %s626_s9, %s777_s9  }
   0xb   : > { %s33_s17 = sadd.s32 1, %s599_s13  ;;  %s42_s18 = sadd.s32 1, %s591_s11 }
   0xc   : > { %p35_p0 = scmp.ge.s32.totalorder %s33_s17, 2  ;;  %p49_p1 = scmp.ne.s32.totalorder %s591_s11, %s587_s10 }
   0xd   : > { %p50_p2 = scmp.eq.s32.totalorder %s603_s14, 0  ;;  %p55_p3 = scmp.ne.s32.totalorder %s587_s10, %s583_s9 }
   0xe   : > { %s783_s17 = smov (%p35_p0, %s33_s17), 0  ;;  %p56_p5 = scmp.eq.s32.totalorder %s366_s15, 0 }
   0xf   : > { %p667_p4 = por %p50_p2, %p49_p1  ;;  %s39_s20 = ssub.s32 %s599_s13, %s783_s17 }
  0x10   : > { %p107_p6 = scmp.eq.s32.totalorder %s366_s15, 1  ;;  %p40_p7 = scmp.eq.s32.totalorder %s39_s20, 0 }
  0x11   : > { %p673_p8 = por %p56_p5, %p55_p3  ;;  %p113_p10 = scmp.eq.s32.totalorder %s367_s16, 1 }
  0x12   : > { %p677_p9 = por %p107_p6, %p49_p1  ;;  %p369_p12 = scmp.ge.s32.totalorder %s603_s14, 2 }
  0x13   : > { %s682_s23 = scalar_select %p40_p7, %s591_s11, %s42_s18  }
  0x14   : > { %p684_p11 = por %p113_p10, %p55_p3  ;;  %p401_p13 = scmp.lt.s32.totalorder %s603_s14, 2 }
  0x15   : > { %s691_s25 = sand.u32 1, %s591_s11   ;;  %s371_s27 = sshll.u32 %s599_s13, 2 }
  0x16   : > { %s370_s26 = sshll.u32 %s691_s25, 3  ;;  %s775_s0 = sld [smem:[#allocation11_spill]] }
  0x17   : > { %s137_s3 = scalar_lea.vmem [#allocation2], %s370_s26  ;;  %p700_p0 = pnand %p401_p13, %p667_p4 }
  0x18   : > { %s145_s4 = sshll.u32 %s137_s3, 4  ;;  %s134_s7 = scalar_lea.sflag [#allocation3], %s691_s25  ;;  %s146_s4 = int_to_ptr.vmem [resolvable:$true] %s145_s4 }
  0x19   : > { %s605_s8 = smov 128   ;;  %s606_s15 = smov 64  }
  0x1a   : > { %s607_s16 = smov 4   ;;  %p374_p1 = scmp.ge.s32.totalorder %s603_s14, 1 }
  0x1b   : > { %p175_p2 = scmp.lt.s32.totalorder %s603_s14, 3  ;;  %s164_s19 = scalar_lea.hbm %s768_s1, %s371_s27 }
  0x1c   : > { %s142_s30 = scalar_lea.hbm %s775_s0, %s371_s27  ;;  %s165_s28 = sshll.u32 %s164_s19, 4  ;;  %s166_s28 = int_to_ptr.hbm [resolvable:$true] %s165_s28 }
  0x1d   : > { %s143_s5 = sshll.u32 %s142_s30, 4  ;;  %p176_p3 = pnand %p374_p1, %p175_p2  ;;  %s144_s5 = int_to_ptr.hbm [resolvable:$true] %s143_s5 }
  0x1e   : > { %393 = dma.hbm_to_vmem [thread:$0]  (!%p700_p0), %s144_s5, 128, %s146_s4, %s134_s7, %s605_s8, %s606_s15, %s607_s16  }
  0x1f   : > { %s159_s29 = scalar_lea.vmem [#allocation5], %s370_s26  ;;  %s156_s3 = scalar_lea.sflag [#allocation6], %s691_s25 }
  0x20   : > { %s167_s30 = sshll.u32 %s159_s29, 4  ;;  %179 = sbr.rel (%p176_p3) target bundleno = 56 (0x38), region = 28  ;;  %s168_s30 = int_to_ptr.vmem [resolvable:$true] %s167_s30 }
  0x21   : > { %396 = dma.hbm_to_vmem [thread:$0]  (!%p700_p0), %s166_s28, 128, %s168_s30, %s156_s3, %s605_s8, %s606_s15, %s607_s16  }
  0x22   : > { %s716_s0 = sand.u32 (!%p176_p3), 1, %s587_s10  }
  0x23   : > { %s375_s4 = sshll.u32 (!%p176_p3), %s716_s0, 3  ;;  %s182_s5 = scalar_lea.sflag (!%p176_p3), [#allocation3], %s716_s0 }
  0x24   : > { %s185_s7 = scalar_lea.vmem (!%p176_p3), [#allocation2], %s375_s4 }
  0x25   : > { %570 = dma.done.wait (%p673_p8), %s182_s5, 128  }
  0x26   : > { %572 = vsyncadd (%p673_p8), %s182_s5, 4294967168  ;;  %s192_s25 = scalar_lea.sflag [#allocation6], %s716_s0  ;;  %s195_s26 = scalar_lea.vmem [#allocation5], %s375_s4 }
  0x27   : > { %574 = dma.done.wait (%p673_p8), %s192_s25, 128  }
  0x28   : > { %576 = vsyncadd (%p673_p8), %s192_s25, 4294967168  ;;  %s221_s27 = scalar_lea.vmem [#allocation7], %s375_s4  ;;  %v608_v0 = vmov 0.0   ;;  %s383_s6 = sshll.u32 %s595_s12, 3  ;;  %v230_v1 = vld [vmem:[%s185_s7] sm:$0xf] }
  0x29   : > { %228 = vst [vmem:[%s221_s27] sm:$0xf] %v608_v0  ;;  %v232_v2 = vld [vmem:[%s195_s26] sm:$0xf]  ;;  %v231_v3 = vld [vmem:[%s185_s7 + $0x4] sm:$0xf]  ;;  %s256_s16 = scalar_lea.hbm %s769_s2, %s383_s6  ;;  %s257_s21 = sshll.u32 %s221_s27, 4  ;;  %s258_s21 = int_to_ptr.vmem [resolvable:$true] %s257_s21 }
  0x2a   : > { %229 = vst [vmem:[%s221_s27 + $0x4] sm:$0xf] %v608_v0  ;;  %v234_v4 = vsub.f32 %v230_v1, %v232_v2  ;;  %v233_v5 = vld [vmem:[%s195_s26 + $0x4] sm:$0xf]  ;;  %s259_s18 = sshll.u32 %s256_s16, 4  ;;  %s245_s12 = scalar_lea.sflag [#allocation4], %s716_s0  ;;  %s260_s18 = int_to_ptr.hbm [resolvable:$true] %s259_s18 }
  0x2b   : > { %v235_v7 = vsub.f32 %v231_v3, %v233_v5  ;;  %s531_s20 = sshra.s32 %s260_s18, 4  ;;  %s537_s30 = scalar_lea.hbm %s769_s2, 16  ;;  %s532_s20 = int_to_ptr.hbm [resolvable:$true] %s531_s20 }
  0x2c   : > { %v236_v8 = vmul.f32 %v234_v4, %v234_v4  ;;  %s533_s19 = scalar_lea.hbm %s532_s20, 8  ;;  %p538_p7 = scmp.lt.s32.totalorder %s532_s20, %s769_s2 }
  0x2d   : > { %v237_v10 = vmul.f32 %v235_v7, %v235_v7  ;;  %p534_p4 = scmp.ne.s32.totalorder %s532_s20, %s533_s19  ;;  %p539_p8 = scmp.lt.s32.totalorder %s537_s30, %s533_s19 }
  0x2f   : > { %p535_p5 = pnand %p534_p4, %p677_p9  ;;  %p540_p10 = por %p539_p8, %p538_p7 }
  0x30   : > { %v238_v6 = vld [vmem:[%s221_s27] sm:$0xf] }
  0x31   : > { %v239_v9 = vld [vmem:[%s221_s27 + $0x4] sm:$0xf]  ;;  %v240_v11 = vadd.f32 %v238_v6, %v236_v8  ;;  %p536_p6 = pneg %p535_p5 }
  0x32   : > { %v241_v12 = vadd.f32 %v239_v9, %v237_v10 }
  0x33   : > { %242 = vst [vmem:[%s221_s27] sm:$0xf] %v240_v11  ;;  %p541_p13 = pnand %p540_p10, %p536_p6 }
  0x34   : > { %243 = vst [vmem:[%s221_s27 + $0x4] sm:$0xf] %v241_v12 }
  0x35   : > { %544 = shalt.err (!%p541_p13)
}
  0x36   : > { %s609_s0 = smov 64   ;;  %s610_s5 = smov 4  }
  0x37   : > { %388 = dma.vmem_to_hbm [thread:$0]  (%p677_p9), %s258_s21, 128, %s260_s18, %s245_s12, %s609_s0, %s609_s0, %s610_s5  }
  0x38 PF: > { %s274_s7 = sand.u32 1, %s583_s9   ;;  %p398_p0 = pnand %p369_p12, %p684_p11 }
  0x39   : > { %s275_s25 = scalar_lea.sflag [#allocation4], %s274_s7 }
  0x3a   : > { %p399_p1 = pneg %p398_p0 }
  0x3c   : > { %578 = dma.done.wait (%p399_p1), %s275_s25, 128  }
  0x3d   : > { %580 = vsyncadd (%p399_p1), %s275_s25, 4294967168  ;;  %s21_s14 = sadd.s32 1, %s603_s14   ;;  %s777_s9 = smov %s587_s10 }
  0x3e   : > { %p18_p2 = scmp.ge.s32.totalorder %s21_s14, 4   ;;  %s778_s10 = smov %s591_s11 }
  0x3f   : > { %s779_s11 = smov %s682_s23  ;;  %s780_s12 = smov %s599_s13 }
  0x40   : > { %s781_s13 = smov %s783_s17  ;;  %20 = sbr.rel (!%p18_p2) target bundleno = 10 (0xa), region = 90 }
  0x45   :  { %281 = vsyncpa [#allocation3], 1 }
  0x46   :  { %283 = vsyncpa [#allocation3 + $0x1], 1 }
  0x47   :  { %284 = vsyncpa [#allocation6], 1 }
  0x48   :  { %286 = vsyncpa [#allocation6 + $0x1], 1 }
  0x49   :  { %287 = vsyncpa [#allocation4], 1 }
  0x4a   :  { %289 = vsyncpa [#allocation4 + $0x1], 1 }

</bundles_post_ra>
